<compile_context>
chip_gen: v7x
topology: tpu7x:2x2x1
jax: 0.10.0
libtpu: 0.0.40
codegen_flags: <defaults>
</compile_context>

<pallas_src>
import functools
import math

import jax
import jax.numpy as jnp
from jax.experimental import pallas as pl
from jax.experimental.pallas import tpu as pltpu


def _flash_qkv_kernel(q_ref, k_ref, v_ref, o_ref, m_ref, l_ref, acc_ref, *,
                      scale2, kv_block, seq_len, mask_pad):
    """One (head-group, query-tile, kv-tile) step of online-softmax attention.

    q_ref: (Hb, C, Tq)   k_ref, v_ref: (Hb, C, Tk)   o_ref: (Hb, C, Tq)
    m_ref, l_ref: (Hb, 1, Tq) f32 scratch    acc_ref: (Hb, C, Tq) f32 scratch
    """
    kv = pl.program_id(2)

    @pl.when(kv == 0)
    def _():
        m_ref[...] = jnp.full(m_ref.shape, -jnp.inf, dtype=m_ref.dtype)
        l_ref[...] = jnp.zeros(l_ref.shape, dtype=l_ref.dtype)
        acc_ref[...] = jnp.zeros(acc_ref.shape, dtype=acc_ref.dtype)

    # Apply the combined scale once, to the small (Hb, C, Tq) operand.
    q = q_ref[...] * scale2
    k = k_ref[...]

    # logits[h, s, t] = sum_c k[h, c, s] * q[h, c, t]   -> (Hb, Tk, Tq)
    # Queries stay on the lane axis; f32 accumulation on the MXU.
    s = jnp.einsum("hcs,hct->hst", k, q, preferred_element_type=jnp.float32)

    if mask_pad:
        # Only padded *keys* need masking; padded query columns are sliced
        # off in the wrapper.
        key_idx = kv * kv_block + jax.lax.broadcasted_iota(
            jnp.int32, (1, kv_block, s.shape[-1]), 1)
        s = jnp.where(key_idx < seq_len, s, -jnp.inf)

    m_prev = m_ref[...]                                        # (Hb, 1, Tq)
    m_new = jnp.maximum(m_prev, jnp.max(s, axis=1, keepdims=True))
    alpha = jnp.exp(m_prev - m_new)                            # (Hb, 1, Tq)
    p = jnp.exp(s - m_new)                                     # (Hb, Tk, Tq) f32

    l_ref[...] = alpha * l_ref[...] + jnp.sum(p, axis=1, keepdims=True)

    # pv[h, c, t] = sum_s v[h, c, s] * p[h, s, t]   (canonical MXU matmul).
    v = v_ref[...]
    pv = jnp.einsum("hcs,hst->hct", v, p.astype(v.dtype),
                    preferred_element_type=jnp.float32)
    acc_ref[...] = alpha * acc_ref[...] + pv
    m_ref[...] = m_new

    @pl.when(kv == pl.num_programs(2) - 1)
    def _():
        # Deferred normalization: one (Hb, C, Tq) scale instead of a
        # (Tk, Tq) normalization per kv step.  (approx=True would push the
        # reciprocal onto the EUP at slightly reduced precision.)
        inv_l = pl.reciprocal(l_ref[...], approx=False)
        o_ref[...] = (acc_ref[...] * inv_l).astype(o_ref.dtype)


def _round_up(x, m):
    return ((x + m - 1) // m) * m


def _pick_seq_tile(t_padded, cap=512):
    """Largest multiple of 128 that divides t_padded and is <= cap."""
    best = 128
    tile = 128
    while tile <= min(t_padded, cap):
        if t_padded % tile == 0:
            best = tile
        tile += 128
    return best


def _pick_head_pack(b, c):
    """Pack heads so hb*C approaches 128 sublanes (capped for VMEM); hb | B."""
    cap = max(1, min(4, 128 // max(c, 1)))
    for hb in range(min(cap, b), 0, -1):
        if b % hb == 0:
            return hb
    return 1


def qkv_attention_legacy(qkv, n_heads, mask=None):
    """Pallas TPU implementation of QKVAttentionLegacy.forward.

    :param qkv: [N, H*3*C, T] array of Qs, Ks and Vs.
    :return: [N, H*C, T] array after attention.
    """
    if mask is not None:
        # TODO(synk): boolean padding-mask path (masked_fill before softmax)
        # of the original module is not implemented in this Pallas kernel.
        raise NotImplementedError("mask is not supported in this Pallas kernel")

    N, width, T = qkv.shape
    assert width % (3 * n_heads) == 0
    C = width // (3 * n_heads)
    B = N * n_heads
    scale = 1.0 / math.sqrt(math.sqrt(C))
    scale2 = scale * scale  # == 1/sqrt(C); applied once (to q) inside the kernel.

    # Free reshape only; q/k/v are selected via BlockSpec index_maps, so no
    # strided q/k/v slices are materialized in HBM.
    qkv4 = qkv.reshape(B, 3, C, T)

    # Lane-dense sequence axis.
    Tp = _round_up(T, 128)
    if Tp != T:
        qkv4 = jnp.pad(qkv4, ((0, 0), (0, 0), (0, 0), (0, Tp - T)))

    tq = _pick_seq_tile(Tp)
    tk = _pick_seq_tile(Tp)
    hb = _pick_head_pack(B, C)
    grid = (B // hb, Tp // tq, Tp // tk)

    kernel = functools.partial(
        _flash_qkv_kernel, scale2=scale2, kv_block=tk, seq_len=T,
        mask_pad=(Tp != T))

    q_spec = pl.BlockSpec((hb, None, C, tq), lambda g, qi, kv: (g, 0, 0, qi))
    k_spec = pl.BlockSpec((hb, None, C, tk), lambda g, qi, kv: (g, 1, 0, kv))
    v_spec = pl.BlockSpec((hb, None, C, tk), lambda g, qi, kv: (g, 2, 0, kv))
    o_spec = pl.BlockSpec((hb, C, tq), lambda g, qi, kv: (g, 0, qi))

    out = pl.pallas_call(
        kernel,
        out_shape=jax.ShapeDtypeStruct((B, C, Tp), qkv.dtype),
        grid_spec=pltpu.PrefetchScalarGridSpec(
            num_scalar_prefetch=0,
            grid=grid,
            in_specs=[q_spec, k_spec, v_spec],
            out_specs=o_spec,
            scratch_shapes=[
                pltpu.VMEM((hb, 1, tq), jnp.float32),   # running max  m
                pltpu.VMEM((hb, 1, tq), jnp.float32),   # running sum  l
                pltpu.VMEM((hb, C, tq), jnp.float32),   # output accumulator
            ],
        ),
        compiler_params=pltpu.CompilerParams(
            dimension_semantics=("parallel", "parallel", "arbitrary")),
    )(qkv4, qkv4, qkv4)

    if Tp != T:
        out = out[:, :, :T]
    return out.reshape(N, n_heads * C, T)


def _qkv_attention_legacy_ref(qkv, n_heads):
    """Pure-JAX reference mirroring the PyTorch module, for verification."""
    N, width, T = qkv.shape
    C = width // (3 * n_heads)
    B = N * n_heads
    qkv_r = qkv.reshape(B, 3 * C, T)
    q, k, v = qkv_r[:, :C], qkv_r[:, C:2 * C], qkv_r[:, 2 * C:]
    scale = 1.0 / math.sqrt(math.sqrt(C))
    w = jnp.einsum("bct,bcs->bts", q * scale, k * scale).astype(jnp.float32)
    w = jax.nn.softmax(w, axis=-1)
    a = jnp.einsum("bts,bcs->bct", w, v.astype(jnp.float32))
    return a.astype(qkv.dtype).reshape(N, -1, T)


if __name__ == "__main__":
    # Case 1: small deterministic example (N=2, heads=2, C=8 per head, T=16).
    n_heads = 2
    N, C, T = 2, 8, 16
    key = jax.random.PRNGKey(0)
    qkv = jax.random.normal(key, (N, n_heads * 3 * C, T), dtype=jnp.float32)
    out = jax.block_until_ready(qkv_attention_legacy(qkv, n_heads))
    ref = _qkv_attention_legacy_ref(qkv, n_heads)
    assert out.shape == (N, n_heads * C, T), out.shape
    assert jnp.allclose(out, ref, atol=1e-4, rtol=1e-4), \
        float(jnp.max(jnp.abs(out - ref)))

    # Case 2: exercises multi-block online softmax + key-padding mask
    # (T=600 -> padded to 640 -> 5 kv blocks of 128).
    n_heads2, N2, C2, T2 = 2, 1, 16, 600
    qkv2 = jax.random.normal(jax.random.PRNGKey(0),
                             (N2, n_heads2 * 3 * C2, T2), dtype=jnp.float32)
    out2 = jax.block_until_ready(qkv_attention_legacy(qkv2, n_heads2))
    ref2 = _qkv_attention_legacy_ref(qkv2, n_heads2)
    assert out2.shape == (N2, n_heads2 * C2, T2), out2.shape
    assert jnp.allclose(out2, ref2, atol=1e-4, rtol=1e-4), \
        float(jnp.max(jnp.abs(out2 - ref2)))

    print("KERNEL_OK")
</pallas_src>

<mosaic_0001>
module attributes {stable_mosaic.version = 11 : i64} {
  func.func @_flash_qkv_kernel(%arg0: i32, %arg1: i32, %arg2: i32, %arg3: memref<4x1x8x128xf32, #tpu.memory_space<vmem>>, %arg4: memref<4x1x8x128xf32, #tpu.memory_space<vmem>>, %arg5: memref<4x1x8x128xf32, #tpu.memory_space<vmem>>, %arg6: memref<4x8x128xf32, #tpu.memory_space<vmem>>, %arg7: memref<4x1x128xf32, #tpu.memory_space<vmem>>, %arg8: memref<4x1x128xf32, #tpu.memory_space<vmem>>, %arg9: memref<4x8x128xf32, #tpu.memory_space<vmem>>) attributes {dimension_semantics = [#tpu.dimension_semantics<parallel>, #tpu.dimension_semantics<parallel>, #tpu.dimension_semantics<arbitrary>], iteration_bounds = array<i64: 1, 1, 1>, scalar_prefetch = 0 : i64, scratch_operands = 3 : i64, tpu.core_type = #tpu.core_type<tc>, window_params = [{transform_indices = @transform_0, window_bounds = array<i64: 4, 1, 8, 128>}, {transform_indices = @transform_1, window_bounds = array<i64: 4, 1, 8, 128>}, {transform_indices = @transform_2, window_bounds = array<i64: 4, 1, 8, 128>}, {transform_indices = @transform_3, window_bounds = array<i64: 4, 8, 128>}]} {
    %c0_i32 = arith.constant 0 : i32
    %0 = arith.cmpi eq, %arg2, %c0_i32 : i32
    %1 = arith.extui %0 : i1 to i32
    %c0_i32_0 = arith.constant 0 : i32
    %2 = arith.cmpi ne, %1, %c0_i32_0 : i32
    scf.if %2 {
      %cst_37 = arith.constant 0xFF800000 : f32
      %47 = vector.broadcast %cst_37 : f32 to vector<4x1x128xf32>
      %c0_38 = arith.constant 0 : index
      %c0_39 = arith.constant 0 : index
      %c0_40 = arith.constant 0 : index
      %48 = vector.load %arg7[%c0_38, %c0_39, %c0_40] : memref<4x1x128xf32, #tpu.memory_space<vmem>>, vector<4x1x128xf32>
      tpu.vector_store %arg7[%c0_38, %c0_39, %c0_40], %47 {strides = array<i32>} : memref<4x1x128xf32, #tpu.memory_space<vmem>>, vector<4x1x128xf32>,
      %cst_41 = arith.constant 0.000000e+00 : f32
      %49 = vector.broadcast %cst_41 : f32 to vector<4x1x128xf32>
      %c0_42 = arith.constant 0 : index
      %c0_43 = arith.constant 0 : index
      %c0_44 = arith.constant 0 : index
      %50 = vector.load %arg8[%c0_42, %c0_43, %c0_44] : memref<4x1x128xf32, #tpu.memory_space<vmem>>, vector<4x1x128xf32>
      tpu.vector_store %arg8[%c0_42, %c0_43, %c0_44], %49 {strides = array<i32>} : memref<4x1x128xf32, #tpu.memory_space<vmem>>, vector<4x1x128xf32>,
      %cst_45 = arith.constant 0.000000e+00 : f32
      %51 = vector.broadcast %cst_45 : f32 to vector<4x8x128xf32>
      %c0_46 = arith.constant 0 : index
      %c0_47 = arith.constant 0 : index
      %c0_48 = arith.constant 0 : index
      %52 = vector.load %arg9[%c0_46, %c0_47, %c0_48] : memref<4x8x128xf32, #tpu.memory_space<vmem>>, vector<4x8x128xf32>
      tpu.vector_store %arg9[%c0_46, %c0_47, %c0_48], %51 {strides = array<i32>} : memref<4x8x128xf32, #tpu.memory_space<vmem>>, vector<4x8x128xf32>,
    } else {
    }
    %c0 = arith.constant 0 : index
    %c0_1 = arith.constant 0 : index
    %c0_2 = arith.constant 0 : index
    %c0_3 = arith.constant 0 : index
    %3 = vector.load %arg3[%c0, %c0_1, %c0_2, %c0_3] : memref<4x1x8x128xf32, #tpu.memory_space<vmem>>, vector<4x1x8x128xf32>
    %4 = vector.shape_cast %3 : vector<4x1x8x128xf32> to vector<4x8x128xf32>
    %cst = arith.constant 0.353553385 : f32
    %5 = vector.broadcast %cst : f32 to vector<4x8x128xf32>
    %6 = arith.mulf %4, %5 : vector<4x8x128xf32>
    %c0_4 = arith.constant 0 : index
    %c0_5 = arith.constant 0 : index
    %c0_6 = arith.constant 0 : index
    %c0_7 = arith.constant 0 : index
    %7 = vector.load %arg4[%c0_4, %c0_5, %c0_6, %c0_7] : memref<4x1x8x128xf32, #tpu.memory_space<vmem>>, vector<4x1x8x128xf32>
    %8 = vector.shape_cast %7 : vector<4x1x8x128xf32> to vector<4x8x128xf32>
    "tpu.trace_start"() <{level = 10 : i32, message = "hcs,hct->hst"}> : () -> ()
    %cst_8 = arith.constant dense<0.000000e+00> : vector<4x128x128xf32>
    %9 = tpu.matmul %8, %6, %cst_8 {dimension_numbers = #tpu.dot_dimension_numbers<[1], [1], [2], [2], [0, 0, 0, 2, 1, 2], [0], [0]>} : vector<4x8x128xf32>, vector<4x8x128xf32>, vector<4x128x128xf32> -> vector<4x128x128xf32>
    "tpu.trace_stop"() : () -> ()
    %c128_i32 = arith.constant 128 : i32
    %10 = arith.muli %arg2, %c128_i32 : i32
    %11 = tpu.iota {dimensions = array<i32: 1>} : vector<1x128x128xi32>
    %12 = vector.broadcast %10 : i32 to vector<1x128x128xi32>
    %13 = arith.addi %12, %11 : vector<1x128x128xi32>
    %c16_i32 = arith.constant 16 : i32
    %14 = vector.broadcast %c16_i32 : i32 to vector<1x128x128xi32>
    %15 = arith.cmpi slt, %13, %14 : vector<1x128x128xi32>
    %cst_9 = arith.constant 0xFF800000 : f32
    %16 = vector.shape_cast %15 : vector<1x128x128xi1> to vector<1x128x128xi1>
    %17 = vector.broadcast %16 : vector<1x128x128xi1> to vector<4x128x128xi1>
    %18 = vector.broadcast %cst_9 : f32 to vector<4x128x128xf32>
    %19 = arith.select %17, %9, %18 : vector<4x128x128xi1>, vector<4x128x128xf32>
    %c0_10 = arith.constant 0 : index
    %c0_11 = arith.constant 0 : index
    %c0_12 = arith.constant 0 : index
    %20 = vector.load %arg7[%c0_10, %c0_11, %c0_12] : memref<4x1x128xf32, #tpu.memory_space<vmem>>, vector<4x1x128xf32>
    %cst_13 = arith.constant dense<0xFF800000> : vector<4x128xf32>
    %21 = vector.multi_reduction <maximumf>, %19, %cst_13 [1] : vector<4x128x128xf32> to vector<4x128xf32>
    %22 = vector.shape_cast %21 : vector<4x128xf32> to vector<4x1x128xf32>
    %23 = arith.maximumf %20, %22 : vector<4x1x128xf32>
    %24 = arith.subf %20, %23 : vector<4x1x128xf32>
    %25 = math.exp %24 : vector<4x1x128xf32>
    %26 = vector.broadcast %23 : vector<4x1x128xf32> to vector<4x128x128xf32>
    %27 = arith.subf %19, %26 : vector<4x128x128xf32>
    %28 = math.exp %27 : vector<4x128x128xf32>
    %c0_14 = arith.constant 0 : index
    %c0_15 = arith.constant 0 : index
    %c0_16 = arith.constant 0 : index
    %29 = vector.load %arg8[%c0_14, %c0_15, %c0_16] : memref<4x1x128xf32, #tpu.memory_space<vmem>>, vector<4x1x128xf32>
    %30 = arith.mulf %25, %29 : vector<4x1x128xf32>
    %cst_17 = arith.constant dense<0.000000e+00> : vector<4x128xf32>
    %31 = vector.multi_reduction <add>, %28, %cst_17 [1] : vector<4x128x128xf32> to vector<4x128xf32>
    %32 = vector.shape_cast %31 : vector<4x128xf32> to vector<4x1x128xf32>
    %33 = arith.addf %30, %32 : vector<4x1x128xf32>
    %c0_18 = arith.constant 0 : index
    %c0_19 = arith.constant 0 : index
    %c0_20 = arith.constant 0 : index
    %34 = vector.load %arg8[%c0_18, %c0_19, %c0_20] : memref<4x1x128xf32, #tpu.memory_space<vmem>>, vector<4x1x128xf32>
    tpu.vector_store %arg8[%c0_18, %c0_19, %c0_20], %33 {strides = array<i32>} : memref<4x1x128xf32, #tpu.memory_space<vmem>>, vector<4x1x128xf32>,
    %c0_21 = arith.constant 0 : index
    %c0_22 = arith.constant 0 : index
    %c0_23 = arith.constant 0 : index
    %c0_24 = arith.constant 0 : index
    %35 = vector.load %arg5[%c0_21, %c0_22, %c0_23, %c0_24] : memref<4x1x8x128xf32, #tpu.memory_space<vmem>>, vector<4x1x8x128xf32>
    %36 = vector.shape_cast %35 : vector<4x1x8x128xf32> to vector<4x8x128xf32>
    "tpu.trace_start"() <{level = 10 : i32, message = "hcs,hst->hct"}> : () -> ()
    %cst_25 = arith.constant dense<0.000000e+00> : vector<4x8x128xf32>
    %37 = tpu.matmul %36, %28, %cst_25 {dimension_numbers = #tpu.dot_dimension_numbers<[2], [1], [1], [2], [0, 0, 0, 1, 1, 2], [0], [0]>} : vector<4x8x128xf32>, vector<4x128x128xf32>, vector<4x8x128xf32> -> vector<4x8x128xf32>
    "tpu.trace_stop"() : () -> ()
    %c0_26 = arith.constant 0 : index
    %c0_27 = arith.constant 0 : index
    %c0_28 = arith.constant 0 : index
    %38 = vector.load %arg9[%c0_26, %c0_27, %c0_28] : memref<4x8x128xf32, #tpu.memory_space<vmem>>, vector<4x8x128xf32>
    %39 = vector.broadcast %25 : vector<4x1x128xf32> to vector<4x8x128xf32>
    %40 = arith.mulf %39, %38 : vector<4x8x128xf32>
    %41 = arith.addf %40, %37 : vector<4x8x128xf32>
    %c0_29 = arith.constant 0 : index
    %c0_30 = arith.constant 0 : index
    %c0_31 = arith.constant 0 : index
    %42 = vector.load %arg9[%c0_29, %c0_30, %c0_31] : memref<4x8x128xf32, #tpu.memory_space<vmem>>, vector<4x8x128xf32>
    tpu.vector_store %arg9[%c0_29, %c0_30, %c0_31], %41 {strides = array<i32>} : memref<4x8x128xf32, #tpu.memory_space<vmem>>, vector<4x8x128xf32>,
    %c0_32 = arith.constant 0 : index
    %c0_33 = arith.constant 0 : index
    %c0_34 = arith.constant 0 : index
    %43 = vector.load %arg7[%c0_32, %c0_33, %c0_34] : memref<4x1x128xf32, #tpu.memory_space<vmem>>, vector<4x1x128xf32>
    tpu.vector_store %arg7[%c0_32, %c0_33, %c0_34], %23 {strides = array<i32>} : memref<4x1x128xf32, #tpu.memory_space<vmem>>, vector<4x1x128xf32>,
    %c0_i32_35 = arith.constant 0 : i32
    %44 = arith.cmpi eq, %arg2, %c0_i32_35 : i32
    %45 = arith.extui %44 : i1 to i32
    %c0_i32_36 = arith.constant 0 : i32
    %46 = arith.cmpi ne, %45, %c0_i32_36 : i32
    scf.if %46 {
      %c0_37 = arith.constant 0 : index
      %c0_38 = arith.constant 0 : index
      %c0_39 = arith.constant 0 : index
      %47 = vector.load %arg8[%c0_37, %c0_38, %c0_39] : memref<4x1x128xf32, #tpu.memory_space<vmem>>, vector<4x1x128xf32>
      %48 = tpu.reciprocal %47 : vector<4x1x128xf32> -> vector<4x1x128xf32>
      %c0_40 = arith.constant 0 : index
      %c0_41 = arith.constant 0 : index
      %c0_42 = arith.constant 0 : index
      %49 = vector.load %arg9[%c0_40, %c0_41, %c0_42] : memref<4x8x128xf32, #tpu.memory_space<vmem>>, vector<4x8x128xf32>
      %50 = vector.broadcast %48 : vector<4x1x128xf32> to vector<4x8x128xf32>
      %51 = arith.mulf %49, %50 : vector<4x8x128xf32>
      %c0_43 = arith.constant 0 : index
      %c0_44 = arith.constant 0 : index
      %c0_45 = arith.constant 0 : index
      %52 = vector.load %arg6[%c0_43, %c0_44, %c0_45] : memref<4x8x128xf32, #tpu.memory_space<vmem>>, vector<4x8x128xf32>
      tpu.vector_store %arg6[%c0_43, %c0_44, %c0_45], %51 {strides = array<i32>} : memref<4x8x128xf32, #tpu.memory_space<vmem>>, vector<4x8x128xf32>,
    } else {
    }
    return
  }
  func.func @transform_0(%arg0: i32, %arg1: i32, %arg2: i32) -> (i32, i32, i32, i32) {
    %c0_i32 = arith.constant 0 : i32
    %c0_i32_0 = arith.constant 0 : i32
    %c0_i32_1 = arith.constant 0 : i32
    return %arg0, %c0_i32, %c0_i32_0, %arg1 : i32, i32, i32, i32
  }
  func.func @transform_1(%arg0: i32, %arg1: i32, %arg2: i32) -> (i32, i32, i32, i32) {
    %c1_i32 = arith.constant 1 : i32
    %c0_i32 = arith.constant 0 : i32
    %c0_i32_0 = arith.constant 0 : i32
    return %arg0, %c1_i32, %c0_i32, %arg2 : i32, i32, i32, i32
  }
  func.func @transform_2(%arg0: i32, %arg1: i32, %arg2: i32) -> (i32, i32, i32, i32) {
    %c2_i32 = arith.constant 2 : i32
    %c0_i32 = arith.constant 0 : i32
    %c0_i32_0 = arith.constant 0 : i32
    return %arg0, %c2_i32, %c0_i32, %arg2 : i32, i32, i32, i32
  }
  func.func @transform_3(%arg0: i32, %arg1: i32, %arg2: i32) -> (i32, i32, i32) {
    %c0_i32 = arith.constant 0 : i32
    %c0_i32_0 = arith.constant 0 : i32
    return %arg0, %c0_i32, %arg1 : i32, i32, i32
  }
}

</mosaic_0001>

<bundles_post_ra>
// kernel: tpu_custom_call.1
= control target key start
LH: loop header
LB: loop body
LE: loop exit
PB: predicated region body
PF: predicated region fallthrough
CT: control target
= control target key end

     0   :  { %8 = vsyncpa [#allocation6], 0  ;;  %s2963_s0 = inlined_call_operand.hbm [shape: f32[4,3,8,128], index: 0, kind: input, shape index: {}]   ;;  %s2964_s1 = inlined_call_operand.hbm [shape: f32[4,3,8,128], index: 1, kind: input, shape index: {}]   ;;  %s2965_s2 = inlined_call_operand.hbm [shape: f32[4,3,8,128], index: 2, kind: input, shape index: {}]   ;;  %s2966_s3 = inlined_call_operand.hbm [shape: f32[4,8,128], index: 3, kind: output, shape index: {}]  }
   0x1   :  { %9 = vsyncpa [#allocation9], 0 }
   0x2   :  { %10 = vsyncpa [#allocation7], 0  ;;  %s2672_s14 = scalar_lea.hbm %s2964_s1, 128  ;;  %s2638_s15 = smov [#allocation8]  }
   0x3   :  { %s29_s16 = sshll.u32 %s2638_s15, 4  ;;  %s2639_s17 = smov [#allocation5]   ;;  %s30_s16 = int_to_ptr.vmem [resolvable:$true] %s29_s16 }
   0x4   :  { %s16_s18 = sshll.u32 %s2639_s17, 4  ;;  %s2562_s21 = scalar_lea.hbm %s2964_s1, 640  ;;  %s2674_s18 = int_to_ptr.vmem [resolvable:$true] %s16_s18 }
   0x5   :  { %p2539_p0 = scmp.ne.s32.totalorder %s2672_s14, %s2562_s21  ;;  %s2540_s24 = scalar_lea.hbm %s2964_s1, 1536 }
   0x6   :  { %p2541_p1 = scmp.lt.u32.totalorder %s2672_s14, %s2964_s1  ;;  %p2542_p2 = scmp.lt.u32.totalorder %s2540_s24, %s2562_s21 }
   0x7   :  { %p2544_p4 = scmp.lt.u32.totalorder %s2562_s21, %s2672_s14 }
   0x8   :  { %p2543_p3 = por %p2542_p2, %p2541_p1 }
   0xa   :  { %p2545_p5 = por %p2544_p4, %p2543_p3 }
   0xc   :  { %p2546_p6 = pnand %p2545_p5, %p2539_p0 }
   0xe   :  { %2549 = shalt.err (!%p2546_p6)
}
   0xf   :  { %s2550_s27 = scalar_lea.vmem %s30_s16, 512  ;;  %p2555_p8 = scmp.lt.s32.totalorder %s30_s16, %s30_s16 }
  0x10   :  { %p2551_p7 = scmp.ne.s32.totalorder %s30_s16, %s2550_s27  ;;  %p2556_p9 = scmp.lt.s32.totalorder %s2550_s27, %s2550_s27 }
  0x12   :  { %p2557_p10 = por %p2556_p9, %p2555_p8 }
  0x14   :  { %p2558_p11 = pnand %p2557_p10, %p2551_p7 }
  0x16   :  { %2561 = shalt.err (!%p2558_p11)
}
  0x17   :  { %s2640_s28 = smov 384   ;;  %s2641_s29 = smov 128  }
  0x18   :  { %s2642_s30 = smov 8   ;;  %s2563_s5 = scalar_lea.hbm %s2963_s0, 512 }
  0x19   :  { %35 = dma.hbm_to_vmem [thread:$0]  %s2672_s14, 512, %s30_s16, [#allocation9], %s2640_s28, %s2641_s29, %s2642_s30  }
  0x1a   :  { %p2564_p12 = scmp.ne.s32.totalorder %s2963_s0, %s2563_s5  ;;  %s2565_s10 = scalar_lea.hbm %s2963_s0, 1536 }
  0x1b   :  { %p2566_p13 = scmp.lt.u32.totalorder %s2565_s10, %s2563_s5  ;;  %p2567_p0 = scmp.lt.u32.totalorder %s2563_s5, %s2963_s0 }
  0x1d   :  { %p2568_p1 = por %p2567_p0, %p2566_p13 }
  0x1f   :  { %p2569_p2 = pnand %p2568_p1, %p2564_p12 }
  0x21   :  { %2572 = shalt.err (!%p2569_p2)
}
  0x22   :  { %s2573_s13 = scalar_lea.vmem %s2674_s18, 512  ;;  %p2578_p4 = scmp.lt.s32.totalorder %s2674_s18, %s2674_s18 }
  0x23   :  { %p2574_p3 = scmp.ne.s32.totalorder %s2674_s18, %s2573_s13  ;;  %p2579_p5 = scmp.lt.s32.totalorder %s2573_s13, %s2573_s13 }
  0x25   :  { %p2580_p6 = por %p2579_p5, %p2578_p4 }
  0x27   :  { %p2581_p7 = pnand %p2580_p6, %p2574_p3 }
  0x29   :  { %2584 = shalt.err (!%p2581_p7)
}
  0x2a   :  { %22 = dma.hbm_to_vmem [thread:$0]  %s2963_s0, 512, %s2674_s18, [#allocation6], %s2640_s28, %s2641_s29, %s2642_s30  }
  0x2b   :  { %s41_s19 = scalar_lea.hbm %s2965_s2, 256  ;;  %s2643_s20 = smov [#allocation10]  }
  0x2c   :  { %s42_s21 = sshll.u32 %s2643_s20, 4  ;;  %s2609_s24 = scalar_lea.hbm %s2965_s2, 768  ;;  %s43_s21 = int_to_ptr.vmem [resolvable:$true] %s42_s21 }
  0x2d   :  { %p2586_p8 = scmp.ne.s32.totalorder %s41_s19, %s2609_s24  ;;  %s2587_s27 = scalar_lea.hbm %s2965_s2, 1536 }
  0x2e   :  { %p2588_p9 = scmp.lt.u32.totalorder %s41_s19, %s2965_s2  ;;  %p2589_p10 = scmp.lt.u32.totalorder %s2587_s27, %s2609_s24 }
  0x2f   :  { %p2591_p12 = scmp.lt.u32.totalorder %s2609_s24, %s41_s19 }
  0x30   :  { %p2590_p11 = por %p2589_p10, %p2588_p9 }
  0x32   :  { %p2592_p13 = por %p2591_p12, %p2590_p11 }
  0x34   :  { %p2593_p0 = pnand %p2592_p13, %p2586_p8 }
  0x36   :  { %2596 = shalt.err (!%p2593_p0)
}
  0x37   :  { %s2597_s0 = scalar_lea.vmem %s43_s21, 512  ;;  %p2602_p2 = scmp.lt.s32.totalorder %s43_s21, %s43_s21 }
  0x38   :  { %p2598_p1 = scmp.ne.s32.totalorder %s43_s21, %s2597_s0  ;;  %p2603_p3 = scmp.lt.s32.totalorder %s2597_s0, %s2597_s0 }
  0x3a   :  { %p2604_p4 = por %p2603_p3, %p2602_p2 }
  0x3c   :  { %p2605_p5 = pnand %p2604_p4, %p2598_p1 }
  0x3e   :  { %2608 = shalt.err (!%p2605_p5)
}
  0x3f   :  { %48 = dma.hbm_to_vmem [thread:$0]  %s41_s19, 512, %s43_s21, [#allocation9], %s2640_s28, %s2641_s29, %s2642_s30  }
  0x40   :  { %2632 = dma.done.wait [#allocation6], 512  }
  0x41   :  { %2633 = vsyncadd [#allocation6], 4294966784 }
  0x42   :  { %2634 = dma.done.wait [#allocation9], 1024  }
  0x43   :  { %2635 = vsyncadd [#allocation9], 4294966272  ;;  %v82_v0 = vld [vmem:[#allocation8] sm:$0xff]  ;;  %v84_v1 = vld [vmem:[#allocation8 + $0x10] sm:$0xff]  ;;  %vm118_vm0 = vcmask 64512   ;;  %v2644_v50 = vmov -inf  }
  0x44   :  { %86 = vxpose.xlu0.b32.start.end [1/1] (short) %v82_v0, 128  ;;  %537 = vxpose.xlu1.b32.start.end [1/1] (short) %v84_v1, 128  ;;  %v74_v2 = vld [vmem:[#allocation5] sm:$0xff]  ;;  %v83_v4 = vld [vmem:[#allocation8 + $0x8] sm:$0xff]  ;;  %v85_v5 = vld [vmem:[#allocation8 + $0x18] sm:$0xff]  ;;  %62 = vst [vmem:[#allocation2] sm:$0x1] %v2644_v50  ;;  %v2645_v59 = vmov 0.0  }
  0x45   :  { %v78_v3 = vmul.f32 0.35355338, %v74_v2  ;;  %v76_v6 = vld [vmem:[#allocation5 + $0x10] sm:$0xff]  ;;  %v75_v8 = vld [vmem:[#allocation5 + $0x8] sm:$0xff]  ;;  %v77_v10 = vld [vmem:[#allocation5 + $0x18] sm:$0xff]  ;;  %v2646_v0 = vmov 0.0|0.0  }
  0x46   :  { %v80_v7 = vmul.f32 0.35355338, %v76_v6  ;;  %v79_v9 = vmul.f32 0.35355338, %v75_v8  ;;  %v81_v11 = vmul.f32 0.35355338, %v77_v10 }
  0x47   :  { %2147 = vmatprep.subr.mxu0 %v78_v3  ;;  %63 = vst [vmem:[#allocation2 + $0x1] sm:$0x1] %v2644_v50  ;;  %64 = vst [vmem:[#allocation2 + $0x2] sm:$0x1] %v2644_v50  ;;  %vm2647_vm1 = vmmov 0   ;;  %s2648_s2 = smov [#allocation11]  }
  0x48   :  { %2148 = vmatpush3.msra.mxu0 %v78_v3  ;;  %2173 = vmatprep.subr.mxu1 %v79_v9  ;;  %65 = vst [vmem:[#allocation2 + $0x3] sm:$0x1] %v2644_v50  ;;  %66 = vst [vmem:[#allocation3] sm:$0x1] %v2645_v59  ;;  %s1934_s18 = sshll.u32 %s2648_s2, 4  ;;  %s1935_s18 = int_to_ptr.vmem [resolvable:$true] %s1934_s18 }
  0x49   :  { %2199 = vmatprep.subr.mxu0 %v80_v7  ;;  %2174 = vmatpush3.msra.mxu1 %v79_v9  ;;  %67 = vst [vmem:[#allocation3 + $0x1] sm:$0x1] %v2645_v59  ;;  %68 = vst [vmem:[#allocation3 + $0x2] sm:$0x1] %v2645_v59  ;;  %s2610_s28 = scalar_lea.vmem %s1935_s18, 512  ;;  %p2615_p7 = scmp.lt.s32.totalorder %s1935_s18, %s1935_s18 }
  0x4a   :  { %2225 = vmatprep.subr.mxu1 %v81_v11  ;;  %69 = vst [vmem:[#allocation3 + $0x3] sm:$0x1] %v2645_v59  ;;  %p2611_p6 = scmp.ne.s32.totalorder %s1935_s18, %s2610_s28  ;;  %p2616_p8 = scmp.lt.s32.totalorder %s2610_s28, %s2610_s28 }
  0x4c   :  { %p2617_p9 = por %p2616_p8, %p2615_p7 }
  0x4e   :  { %p2618_p10 = pnand %p2617_p9, %p2611_p6 }
  0x81   :  { %312 = vxpose.xlu0.b32.start.end [1/1] (short) %v83_v4, 128  ;;  %762 = vxpose.xlu1.b32.start.end [1/1] (short) %v85_v5, 128 }
  0xc4   :  { %v102_v12 = vpop.trf.xlu0  ;;  %v553_v13 = vpop.trf.xlu1 }
  0xc5   :  { %2149 = vmatprep.mubr.msk.f32.mxu0 %vm118_vm0, %v102_v12 }
  0xc8   :  { %v103_v14 = vpop.trf.xlu0  ;;  %v554_v15 = vpop.trf.xlu1 }
  0xc9   :  { %2150 = vmatmul.mubr.msk.f32.vlgmr.msra.gmra.mrb[0].mxu0 %vm118_vm0, %v103_v14 }
  0xca   :  { %2200 = vmatpush3.msra.mxu0 %v80_v7 }
  0xcb   :  { %2391 = vmatprep.subr.bf16.mxu0 %v2646_v0 }
  0xcc   :  { %v104_v16 = vpop.trf.xlu0  ;;  %v555_v18 = vpop.trf.xlu1 }
  0xcd   :  { %2152 = vmatprep.mubr.msk.f32.mxu0 %vm118_vm0, %v104_v16 }
  0xd0   :  { %v105_v17 = vpop.trf.xlu0  ;;  %v556_v20 = vpop.trf.xlu1 }
  0xd1   :  { %2153 = vmatmul.mubr.msk.f32.gmra.mrb[2].mxu0 %vm118_vm0, %v105_v17 }
  0xd4   :  { %v106_v19 = vpop.trf.xlu0  ;;  %v557_v23 = vpop.trf.xlu1 }
  0xd5   :  { %2155 = vmatprep.mubr.msk.f32.mxu0 %vm118_vm0, %v106_v19 }
  0xd8   :  { %v107_v21 = vpop.trf.xlu0  ;;  %v558_v25 = vpop.trf.xlu1 }
  0xd9   :  { %2156 = vmatmul.mubr.msk.f32.gmra.mrb[4].mxu0 %vm118_vm0, %v107_v21 }
  0xdc   :  { %v108_v22 = vpop.trf.xlu0  ;;  %v559_v28 = vpop.trf.xlu1 }
  0xdd   :  { %2158 = vmatprep.mubr.msk.f32.mxu0 %vm118_vm0, %v108_v22 }
  0xe0   :  { %v109_v24 = vpop.trf.xlu0  ;;  %v560_v30 = vpop.trf.xlu1 }
  0xe1   :  { %2159 = vmatmul.mubr.msk.f32.gmra.mrb[6].mxu0 %vm118_vm0, %v109_v24 }
  0xe4   :  { %v110_v26 = vpop.trf.xlu0  ;;  %v561_v33 = vpop.trf.xlu1 }
  0xe5   :  { %2161 = vmatprep.mubr.msk.f32.mxu0 %vm118_vm0, %v110_v26 }
  0xe8   :  { %v111_v27 = vpop.trf.xlu0  ;;  %v562_v35 = vpop.trf.xlu1 }
  0xe9   :  { %2162 = vmatmul.mubr.msk.f32.gmra.mrb[8].mxu0 %vm118_vm0, %v111_v27  ;;  %v1134_v27 = vld [vmem:[#allocation2] sm:$0x1] }
  0xec   :  { %v112_v29 = vpop.trf.xlu0  ;;  %v563_v38 = vpop.trf.xlu1 }
  0xed   :  { %2164 = vmatprep.mubr.msk.f32.mxu0 %vm118_vm0, %v112_v29 }
  0xf0   :  { %v113_v31 = vpop.trf.xlu0  ;;  %v564_v40 = vpop.trf.xlu1 }
  0xf1   :  { %2165 = vmatmul.mubr.msk.f32.gmra.mrb[10].mxu0 %vm118_vm0, %v113_v31 }
  0xf4   :  { %v114_v32 = vpop.trf.xlu0  ;;  %v565_v43 = vpop.trf.xlu1 }
  0xf5   :  { %2167 = vmatprep.mubr.msk.f32.mxu0 %vm118_vm0, %v114_v32 }
  0xf8   :  { %v115_v34 = vpop.trf.xlu0  ;;  %v566_v45 = vpop.trf.xlu1 }
  0xf9   :  { %2168 = vmatmul.mubr.msk.f32.gmra.mrb[12].mxu0 %vm118_vm0, %v115_v34 }
  0xfc   :  { %v116_v36 = vpop.trf.xlu0  ;;  %v567_v48 = vpop.trf.xlu1 }
  0xfd   :  { %2170 = vmatprep.mubr.msk.f32.mxu0 %vm118_vm0, %v116_v36 }
 0x100   :  { %v117_v37 = vpop.trf.xlu0  ;;  %v568_v51 = vpop.trf.xlu1 }
 0x101   :  { %2171 = vmatmul.mubr.msk.f32.gmra.mrb[14].mxu0 %vm118_vm0, %v117_v37 }
 0x102   :  { %2201 = vmatprep.mubr.msk.f32.mxu0 %vm118_vm0, %v553_v13 }
 0x104   :  { %v328_v39 = vpop.trf.xlu0  ;;  %v778_v61 = vpop.trf.xlu1 }
 0x105   :  { %2175 = vmatprep.mubr.msk.f32.mxu1 %vm118_vm0, %v328_v39  ;;  %2202 = vmatmul.mubr.msk.f32.vlgmr.msra.gmra.mrb[16].mxu0 %vm118_vm0, %v554_v15 }
 0x106   :  { %2204 = vmatprep.mubr.msk.f32.mxu0 %vm118_vm0, %v555_v18 }
 0x108   :  { %v329_v41 = vpop.trf.xlu0  ;;  %v779_v63 = vpop.trf.xlu1 }
 0x109   :  { %2176 = vmatmul.mubr.msk.f32.vlgmr.msra.gmra.mrb[0].mxu1 %vm118_vm0, %v329_v41  ;;  %2205 = vmatmul.mubr.msk.f32.gmra.mrb[18].mxu0 %vm118_vm0, %v556_v20  ;;  %v1242_v20 = vlaneseq }
 0x10a   :  { %2207 = vmatprep.mubr.msk.f32.mxu0 %vm118_vm0, %v557_v23  ;;  %2226 = vmatpush3.msra.mxu1 %v81_v11 }
 0x10b   :  { %2415 = vmatprep.subr.bf16.mxu1 %v2646_v0 }
 0x10c   :  { %v330_v42 = vpop.trf.xlu0  ;;  %v780_v1 = vpop.trf.xlu1 }
 0x10d   :  { %2178 = vmatprep.mubr.msk.f32.mxu1 %vm118_vm0, %v330_v42  ;;  %2208 = vmatmul.mubr.msk.f32.gmra.mrb[20].mxu0 %vm118_vm0, %v558_v25  ;;  %v1243_v25 = vshrl.u32 %v1242_v20, 7  ;;  %v1554_v20 = vld [vmem:[#allocation10] sm:$0xff] }
 0x10e   :  { %2210 = vmatprep.mubr.msk.f32.mxu0 %vm118_vm0, %v559_v28 }
 0x10f   :  { %v2804_v29 = vsub.s32 0, %v1243_v25 }
 0x110   :  { %v331_v44 = vpop.trf.xlu0  ;;  %v781_v2 = vpop.trf.xlu1 }
 0x111   :  { %2179 = vmatmul.mubr.msk.f32.gmra.mrb[2].mxu1 %vm118_vm0, %v331_v44  ;;  %2211 = vmatmul.mubr.msk.f32.gmra.mrb[22].mxu0 %vm118_vm0, %v560_v30 }
 0x112   :  { %2213 = vmatprep.mubr.msk.f32.mxu0 %vm118_vm0, %v561_v33 }
 0x114   :  { %v332_v46 = vpop.trf.xlu0  ;;  %v782_v3 = vpop.trf.xlu1 }
 0x115   :  { %2181 = vmatprep.mubr.msk.f32.mxu1 %vm118_vm0, %v332_v46  ;;  %2214 = vmatmul.mubr.msk.f32.gmra.mrb[24].mxu0 %vm118_vm0, %v562_v35 }
 0x116   :  { %2216 = vmatprep.mubr.msk.f32.mxu0 %vm118_vm0, %v563_v38 }
 0x118   :  { %v333_v47 = vpop.trf.xlu0  ;;  %v783_v4 = vpop.trf.xlu1 }
 0x119   :  { %2182 = vmatmul.mubr.msk.f32.gmra.mrb[4].mxu1 %vm118_vm0, %v333_v47  ;;  %2217 = vmatmul.mubr.msk.f32.gmra.mrb[26].mxu0 %vm118_vm0, %v564_v40 }
 0x11a   :  { %2219 = vmatprep.mubr.msk.f32.mxu0 %vm118_vm0, %v565_v43 }
 0x11c   :  { %v334_v49 = vpop.trf.xlu0  ;;  %v784_v5 = vpop.trf.xlu1 }
 0x11d   :  { %2184 = vmatprep.mubr.msk.f32.mxu1 %vm118_vm0, %v334_v49  ;;  %2220 = vmatmul.mubr.msk.f32.gmra.mrb[28].mxu0 %vm118_vm0, %v566_v45 }
 0x11e   :  { %2222 = vmatprep.mubr.msk.f32.mxu0 %vm118_vm0, %v567_v48 }
 0x120   :  { %v335_v52 = vpop.trf.xlu0  ;;  %v785_v6 = vpop.trf.xlu1 }
 0x121   :  { %2185 = vmatmul.mubr.msk.f32.gmra.mrb[6].mxu1 %vm118_vm0, %v335_v52  ;;  %2223 = vmatmul.mubr.msk.f32.gmra.mrb[30].mxu0 %vm118_vm0, %v568_v51 }
 0x122   :  { %2283 = vmatprep.mubr.msk.f32.mxu0 %vm2647_vm1, %v2645_v59 }
 0x124   :  { %v336_v53 = vpop.trf.xlu0  ;;  %v786_v7 = vpop.trf.xlu1 }
 0x125   :  { %2187 = vmatprep.mubr.msk.f32.mxu1 %vm118_vm0, %v336_v53 }
 0x128   :  { %v337_v54 = vpop.trf.xlu0  ;;  %v787_v8 = vpop.trf.xlu1 }
 0x129   :  { %2188 = vmatmul.mubr.msk.f32.gmra.mrb[8].mxu1 %vm118_vm0, %v337_v54 }
 0x12c   :  { %v338_v55 = vpop.trf.xlu0  ;;  %v788_v9 = vpop.trf.xlu1 }
 0x12d   :  { %2190 = vmatprep.mubr.msk.f32.mxu1 %vm118_vm0, %v338_v55 }
 0x130   :  { %v339_v56 = vpop.trf.xlu0  ;;  %v789_v10 = vpop.trf.xlu1 }
 0x131   :  { %2191 = vmatmul.mubr.msk.f32.gmra.mrb[10].mxu1 %vm118_vm0, %v339_v56 }
 0x134   :  { %v340_v57 = vpop.trf.xlu0  ;;  %v790_v11 = vpop.trf.xlu1 }
 0x135   :  { %2193 = vmatprep.mubr.msk.f32.mxu1 %vm118_vm0, %v340_v57 }
 0x138   :  { %v341_v58 = vpop.trf.xlu0  ;;  %v791_v12 = vpop.trf.xlu1 }
 0x139   :  { %2194 = vmatmul.mubr.msk.f32.gmra.mrb[12].mxu1 %vm118_vm0, %v341_v58 }
 0x13c   :  { %v342_v60 = vpop.trf.xlu0  ;;  %v792_v13 = vpop.trf.xlu1 }
 0x13d   :  { %2196 = vmatprep.mubr.msk.f32.mxu1 %vm118_vm0, %v342_v60 }
 0x140   :  { %v343_v62 = vpop.trf.xlu0  ;;  %v793_v17 = vpop.trf.xlu1 }
 0x141   :  { %2197 = vmatmul.mubr.msk.f32.gmra.mrb[14].mxu1 %vm118_vm0, %v343_v62 }
 0x142   :  { %2227 = vmatprep.mubr.msk.f32.mxu1 %vm118_vm0, %v778_v61 }
 0x145   :  { %2228 = vmatmul.mubr.msk.f32.vlgmr.msra.gmra.mrb[16].mxu1 %vm118_vm0, %v779_v63 }
 0x146   :  { %2230 = vmatprep.mubr.msk.f32.mxu1 %vm118_vm0, %v780_v1 }
 0x149   :  { %2231 = vmatmul.mubr.msk.f32.gmra.mrb[18].mxu1 %vm118_vm0, %v781_v2 }
 0x14a   :  { %2233 = vmatprep.mubr.msk.f32.mxu1 %vm118_vm0, %v782_v3 }
 0x14d   :  { %2234 = vmatmul.mubr.msk.f32.gmra.mrb[20].mxu1 %vm118_vm0, %v783_v4 }
 0x14e   :  { %2236 = vmatprep.mubr.msk.f32.mxu1 %vm118_vm0, %v784_v5 }
 0x151   :  { %2237 = vmatmul.mubr.msk.f32.gmra.mrb[22].mxu1 %vm118_vm0, %v785_v6 }
 0x152   :  { %2239 = vmatprep.mubr.msk.f32.mxu1 %vm118_vm0, %v786_v7 }
 0x155   :  { %2240 = vmatmul.mubr.msk.f32.gmra.mrb[24].mxu1 %vm118_vm0, %v787_v8 }
 0x156   :  { %2242 = vmatprep.mubr.msk.f32.mxu1 %vm118_vm0, %v788_v9 }
 0x159   :  { %2243 = vmatmul.mubr.msk.f32.gmra.mrb[26].mxu1 %vm118_vm0, %v789_v10 }
 0x15a   :  { %2245 = vmatprep.mubr.msk.f32.mxu1 %vm118_vm0, %v790_v11 }
 0x15d   :  { %2246 = vmatmul.mubr.msk.f32.gmra.mrb[28].mxu1 %vm118_vm0, %v791_v12 }
 0x15e   :  { %2248 = vmatprep.mubr.msk.f32.mxu1 %vm118_vm0, %v792_v13 }
 0x161   :  { %2249 = vmatmul.mubr.msk.f32.gmra.mrb[30].mxu1 %vm118_vm0, %v793_v17 }
 0x162   :  { %2318 = vmatprep.mubr.msk.f32.mxu1 %vm2647_vm1, %v2645_v59 }
 0x19c   :  { %v2151_v14 = vpop.f32.mrb[0].mxu0 }
 0x19d   :  { %v233_v15 = vpop.f32.mrb[1].mxu0 }
 0x19e   :  { %v1138_v16 = vmax.f32 %v233_v15, %v2151_v14 }
 0x1a0   :  { %v1153_v18 = vrot.slane %v1138_v16, 4 }
 0x1a2   :  { %v1154_v19 = vmax.f32 %v1138_v16, %v1153_v18 }
 0x1a4   :  { %v1155_v21 = vrot.slane %v1154_v19, 2  ;;  %v2154_v22 = vpop.f32.mrb[2].mxu0 }
 0x1a5   :  { %v243_v23 = vpop.f32.mrb[3].mxu0 }
 0x1a6   :  { %v1156_v24 = vmax.f32 %v1154_v19, %v1155_v21 }
 0x1a8   :  { %v1157_v26 = vrot.slane %v1156_v24, 1 }
 0x1aa   :  { %v1158_v28 = vmax.f32 %v1156_v24, %v1157_v26 }
 0x1ac   :  { %v1222_v30 = vmax.f32 %v1134_v27, %v1158_v28  ;;  %v2157_v31 = vpop.f32.mrb[4].mxu0 }
 0x1ad   :  { %v253_v32 = vpop.f32.mrb[5].mxu0 }
 0x1ae   :  { %v1245_v33 = vrot.slane %v1222_v30, %v2804_v29  ;;  %1878 = vst [vmem:[#allocation2] sm:$0x1] %v1222_v30  ;;  %v1226_v1 = vsub.f32 %v1134_v27, %v1222_v30 }
 0x1b0   :  { %v1262_v34 = vsub.f32 %v233_v15, %v1245_v33  ;;  %v1263_v35 = vsub.f32 %v2151_v14, %v1245_v33  ;;  %v1264_v36 = vsub.f32 -inf, %v1245_v33  ;;  %v1230_v6 = vmul.f32 1.442695, %v1226_v1 }
 0x1b2   :  { %v1326_v37 = vmul.f32 1.442695, %v1262_v34  ;;  %v1328_v38 = vmul.f32 1.442695, %v1263_v35  ;;  %v1330_v39 = vmul.f32 1.442695, %v1264_v36 }
 0x1b4   :  { %2498 = vpow2.f32 %v1326_v37  ;;  %v2160_v40 = vpop.f32.mrb[6].mxu0  ;;  %v2828_v37 = vld [vmem:[#allocation2 + $0x2] sm:$0x1] }
 0x1b5   :  { %2500 = vpow2.f32 %v1328_v38  ;;  %v263_v41 = vpop.f32.mrb[7].mxu0  ;;  %v1454_v40 = vld [vmem:[#allocation3] sm:$0x1] }
 0x1b6   :  { %2502 = vpow2.f32 %v1330_v39 }
 0x1b7   :  { %2504 = vpow2.f32 %v1230_v6 }
 0x1bc   :  { %v2163_v42 = vpop.f32.mrb[8].mxu0 }
 0x1bd   :  { %v273_v43 = vpop.f32.mrb[9].mxu0 }
 0x1be   :  { %v2499_v44 = vpop.eup %2498 }
 0x1bf   :  { %v2501_v45 = vpop.eup %2500 }
 0x1c0   :  { %v1462_v46 = vadd.f32 %v2501_v45, %v2499_v44  ;;  %v2392_v47 = vpack.c.bf16 %v2501_v45, %v2499_v44  ;;  %v2503_v48 = vpop.eup %2502 }
 0x1c1   :  { %v2395_v52 = vpack.c.bf16 %v2503_v48, %v2503_v48  ;;  %v2826_v36 = vpop.eup %2504 }
 0x1c2   :  { %v1463_v49 = vadd.f32 %v2503_v48, %v1462_v46  ;;  %2393 = vmatpush3.bf16.msra.mxu0 %v2392_v47  ;;  %v1458_v47 = vmul.f32 %v2826_v36, %v1454_v40 }
 0x1c3   :  { %2394 = vmatprep.subr.bf16.mxu0 %v2646_v0 }
 0x1c4   :  { %v1464_v50 = vadd.f32 %v2503_v48, %v1463_v49  ;;  %v2166_v51 = vpop.f32.mrb[10].mxu0  ;;  %v2834_v49 = vld [vmem:[#allocation2 + $0x1] sm:$0x1] }
 0x1c5   :  { %v283_v53 = vpop.f32.mrb[11].mxu0 }
 0x1c6   :  { %v1465_v54 = vadd.f32 %v2503_v48, %v1464_v50  ;;  %2396 = vmatpush3.bf16.msra.mxu0 %v2395_v52 }
 0x1c7   :  { %2397 = vmatprep.subr.bf16.mxu0 %v2646_v0 }
 0x1c8   :  { %v1466_v55 = vadd.f32 %v2503_v48, %v1465_v54 }
 0x1ca   :  { %v1467_v56 = vadd.f32 %v2503_v48, %v1466_v55  ;;  %2399 = vmatpush3.bf16.msra.mxu0 %v2395_v52 }
 0x1cb   :  { %2400 = vmatprep.subr.bf16.mxu0 %v2646_v0 }
 0x1cc   :  { %v1468_v57 = vadd.f32 %v2503_v48, %v1467_v56  ;;  %v2169_v58 = vpop.f32.mrb[12].mxu0 }
 0x1cd   :  { %v293_v60 = vpop.f32.mrb[13].mxu0 }
 0x1ce   :  { %v1469_v61 = vadd.f32 %v2503_v48, %v1468_v57  ;;  %2402 = vmatpush3.bf16.msra.mxu0 %v2395_v52 }
 0x1cf   :  { %2403 = vmatprep.subr.bf16.mxu0 %v2646_v0 }
 0x1d0   :  { %v1470_v62 = vadd.f32 %v2503_v48, %v1469_v61 }
 0x1d2   :  { %v1471_v63 = vadd.f32 %v2503_v48, %v1470_v62  ;;  %2405 = vmatpush3.bf16.msra.mxu0 %v2395_v52 }
 0x1d3   :  { %2406 = vmatprep.subr.bf16.mxu0 %v2646_v0 }
 0x1d4   :  { %v1472_v2 = vadd.f32 %v2503_v48, %v1471_v63  ;;  %v2172_v3 = vpop.f32.mrb[14].mxu0 }
 0x1d5   :  { %v303_v4 = vpop.f32.mrb[15].mxu0 }
 0x1d6   :  { %v1473_v5 = vadd.f32 %v2503_v48, %v1472_v2  ;;  %2408 = vmatpush3.bf16.msra.mxu0 %v2395_v52 }
 0x1d7   :  { %2409 = vmatprep.subr.bf16.mxu0 %v2646_v0 }
 0x1d8   :  { %v1474_v7 = vadd.f32 %v2503_v48, %v1473_v5  ;;  %v2813_v8 = vpop.f32.mrb[16].mxu0 }
 0x1d9   :  { %v683_v9 = vpop.f32.mrb[17].mxu0 }
 0x1da   :  { %v1180_v10 = vmax.f32 %v683_v9, %v2813_v8  ;;  %2411 = vmatpush3.bf16.msra.mxu0 %v2395_v52  ;;  %v1475_v11 = vadd.f32 %v2503_v48, %v1474_v7 }
 0x1db   :  { %2412 = vmatprep.subr.bf16.mxu0 %v2646_v0 }
 0x1dc   :  { %v1195_v12 = vrot.slane %v1180_v10, 4  ;;  %v2817_v13 = vpop.f32.mrb[0].mxu1  ;;  %v2206_v14 = vpop.f32.mrb[18].mxu0  ;;  %v1476_v15 = vadd.f32 %v2503_v48, %v1475_v11 }
 0x1dd   :  { %v2819_v16 = vpop.f32.mrb[1].mxu1  ;;  %v693_v17 = vpop.f32.mrb[19].mxu0 }
 0x1de   :  { %v1196_v18 = vmax.f32 %v1180_v10, %v1195_v12  ;;  %v1159_v19 = vmax.f32 %v2819_v16, %v2817_v13  ;;  %2414 = vmatpush3.bf16.msra.mxu0 %v2395_v52  ;;  %v1477_v21 = vrot.slane %v1476_v15, 4 }
 0x1df   :  { %2439 = vmatprep.subr.bf16.mxu0 %v2646_v0 }
 0x1e0   :  { %v1197_v22 = vrot.slane %v1196_v18, 2  ;;  %v1174_v23 = vrot.slane %v1159_v19, 4  ;;  %v2209_v24 = vpop.f32.mrb[20].mxu0  ;;  %v1478_v25 = vadd.f32 %v1477_v21, %v1476_v15 }
 0x1e1   :  { %2284 = vmatmul.mubr.f32.vlgmr.msra.gmra.mrb[32].mxu0 %v1554_v20  ;;  %v703_v26 = vpop.f32.mrb[21].mxu0 }
 0x1e2   :  { %v1198_v27 = vmax.f32 %v1196_v18, %v1197_v22  ;;  %v1175_v28 = vmax.f32 %v1159_v19, %v1174_v23  ;;  %2353 = vmatprep.mubr.msk.f32.mxu0 %vm2647_vm1, %v2645_v59  ;;  %v1479_v30 = vrot.slane %v1478_v25, 2 }
 0x1e4   :  { %v1199_v31 = vrot.slane %v1198_v27, 1  ;;  %v1176_v32 = vrot.slane %v1175_v28, 2  ;;  %v2180_v33 = vpop.f32.mrb[2].mxu1  ;;  %v2212_v34 = vpop.f32.mrb[22].mxu0  ;;  %v1480_v35 = vadd.f32 %v1479_v30, %v1478_v25 }
 0x1e5   :  { %v468_v38 = vpop.f32.mrb[3].mxu1  ;;  %v713_v39 = vpop.f32.mrb[23].mxu0 }
 0x1e6   :  { %v1200_v41 = vmax.f32 %v1198_v27, %v1199_v31  ;;  %v1177_v42 = vmax.f32 %v1175_v28, %v1176_v32  ;;  %v1481_v43 = vrot.slane %v1480_v35, 1 }
 0x1e8   :  { %v2831_v44 = vmax.f32 %v2828_v37, %v1200_v41  ;;  %v1178_v45 = vrot.slane %v1177_v42, 1  ;;  %v2215_v46 = vpop.f32.mrb[24].mxu0  ;;  %v1482_v48 = vadd.f32 %v1481_v43, %v1480_v35 }
 0x1e9   :  { %v723_v50 = vpop.f32.mrb[25].mxu0 }
 0x1ea   :  { %v1253_v51 = vrot.slane %v2831_v44, %v2804_v29  ;;  %1880 = vst [vmem:[#allocation2 + $0x2] sm:$0x1] %v2831_v44  ;;  %v1179_v52 = vmax.f32 %v1177_v42, %v1178_v45  ;;  %v1546_v53 = vadd.f32 %v1482_v48, %v1458_v47 }
 0x1ec   :  { %v1294_v54 = vsub.f32 %v683_v9, %v1253_v51  ;;  %v1295_v55 = vsub.f32 %v2813_v8, %v1253_v51  ;;  %v1296_v56 = vsub.f32 -inf, %v1253_v51  ;;  %v2841_v57 = vmax.f32 %v2834_v49, %v1179_v52  ;;  %v2183_v58 = vpop.f32.mrb[4].mxu1  ;;  %v2218_v60 = vpop.f32.mrb[26].mxu0  ;;  %1550 = vst [vmem:[#allocation3] sm:$0x1] %v1546_v53 }
 0x1ed   :  { %v478_v61 = vpop.f32.mrb[5].mxu1  ;;  %v733_v62 = vpop.f32.mrb[27].mxu0 }
 0x1ee   :  { %v1390_v63 = vmul.f32 1.442695, %v1294_v54  ;;  %v1392_v1 = vmul.f32 1.442695, %v1295_v55  ;;  %1879 = vst [vmem:[#allocation2 + $0x1] sm:$0x1] %v2841_v57  ;;  %v1249_v3 = vrot.slane %v2841_v57, %v2804_v29  ;;  %v1228_v54 = vsub.f32 %v2828_v37, %v2831_v44 }
 0x1ef   :  { %v1394_v2 = vmul.f32 1.442695, %v1296_v56  ;;  %v1227_v62 = vsub.f32 %v2834_v49, %v2841_v57 }
 0x1f0   :  { %2506 = vpow2.f32 %v1390_v63  ;;  %v2221_v4 = vpop.f32.mrb[28].mxu0  ;;  %v1278_v5 = vsub.f32 %v2819_v16, %v1249_v3  ;;  %v1279_v6 = vsub.f32 %v2817_v13, %v1249_v3  ;;  %v1280_v7 = vsub.f32 -inf, %v1249_v3 }
 0x1f1   :  { %2508 = vpow2.f32 %v1392_v1  ;;  %v743_v8 = vpop.f32.mrb[29].mxu0  ;;  %v1234_v37 = vmul.f32 1.442695, %v1228_v54  ;;  %v1232_v57 = vmul.f32 1.442695, %v1227_v62 }
 0x1f2   :  { %2510 = vpow2.f32 %v1394_v2  ;;  %v1358_v9 = vmul.f32 1.442695, %v1278_v5  ;;  %v1360_v10 = vmul.f32 1.442695, %v1279_v6  ;;  %v1362_v11 = vmul.f32 1.442695, %v1280_v7 }
 0x1f4   :  { %v2186_v12 = vpop.f32.mrb[6].mxu1  ;;  %v2224_v14 = vpop.f32.mrb[30].mxu0  ;;  %2512 = vpow2.f32 %v1358_v9  ;;  %v1556_v9 = vld [vmem:[#allocation10 + $0x10] sm:$0xff] }
 0x1f5   :  { %v488_v15 = vpop.f32.mrb[7].mxu1  ;;  %v753_v17 = vpop.f32.mrb[31].mxu0  ;;  %2514 = vpow2.f32 %v1360_v10 }
 0x1f6   :  { %2516 = vpow2.f32 %v1362_v11 }
 0x1f7   :  { %2518 = vpow2.f32 %v1234_v37 }
 0x1f8   :  { %2520 = vpow2.f32 %v1232_v57 }
 0x1fa   :  { %v2507_v18 = vpop.eup %2506 }
 0x1fb   :  { %v2509_v19 = vpop.eup %2508 }
 0x1fc   :  { %v1504_v20 = vadd.f32 %v2509_v19, %v2507_v18  ;;  %v2189_v21 = vpop.f32.mrb[8].mxu1  ;;  %v2440_v16 = vpack.c.bf16 %v2509_v19, %v2507_v18  ;;  %v2848_v22 = vpop.eup %2510  ;;  %v1555_v19 = vld [vmem:[#allocation10 + $0x8] sm:$0xff] }
 0x1fd   :  { %v498_v13 = vpop.f32.mrb[9].mxu1  ;;  %v2855_v27 = vpack.c.bf16 %v2848_v22, %v2848_v22 }
 0x1fe   :  { %v1505_v23 = vadd.f32 %v2848_v22, %v1504_v20  ;;  %2441 = vmatpush3.bf16.msra.mxu0 %v2440_v16  ;;  %v2513_v24 = vpop.eup %2512  ;;  %v1456_v13 = vld [vmem:[#allocation3 + $0x2] sm:$0x1] }
 0x1ff   :  { %2442 = vmatprep.subr.bf16.mxu0 %v2646_v0  ;;  %v2515_v25 = vpop.eup %2514 }
 0x200   :  { %v1506_v26 = vadd.f32 %v2848_v22, %v1505_v23  ;;  %v1483_v28 = vadd.f32 %v2515_v25, %v2513_v24  ;;  %v2416_v30 = vpack.c.bf16 %v2515_v25, %v2513_v24  ;;  %v2857_v31 = vpop.eup %2516 }
 0x201   :  { %v2868_v40 = vpack.c.bf16 %v2857_v31, %v2857_v31 }
 0x202   :  { %v1507_v32 = vadd.f32 %v2848_v22, %v1506_v26  ;;  %2444 = vmatpush3.bf16.msra.mxu0 %v2855_v27  ;;  %v1484_v33 = vadd.f32 %v2857_v31, %v1483_v28  ;;  %2417 = vmatpush3.bf16.msra.mxu1 %v2416_v30 }
 0x203   :  { %2445 = vmatprep.subr.bf16.mxu0 %v2646_v0  ;;  %2418 = vmatprep.subr.bf16.mxu1 %v2646_v0 }
 0x204   :  { %v1508_v34 = vadd.f32 %v2848_v22, %v1507_v32  ;;  %v2192_v35 = vpop.f32.mrb[10].mxu1  ;;  %v1485_v38 = vadd.f32 %v2857_v31, %v1484_v33 }
 0x205   :  { %v508_v39 = vpop.f32.mrb[11].mxu1 }
 0x206   :  { %v1509_v41 = vadd.f32 %v2848_v22, %v1508_v34  ;;  %2447 = vmatpush3.bf16.msra.mxu0 %v2855_v27  ;;  %v1486_v42 = vadd.f32 %v2857_v31, %v1485_v38  ;;  %2420 = vmatpush3.bf16.msra.mxu1 %v2868_v40  ;;  %v1455_v38 = vld [vmem:[#allocation3 + $0x1] sm:$0x1] }
 0x207   :  { %2448 = vmatprep.subr.bf16.mxu0 %v2646_v0  ;;  %2421 = vmatprep.subr.bf16.mxu1 %v2646_v0 }
 0x208   :  { %v1510_v43 = vadd.f32 %v2848_v22, %v1509_v41  ;;  %v1487_v45 = vadd.f32 %v2857_v31, %v1486_v42 }
 0x20a   :  { %v1511_v46 = vadd.f32 %v2848_v22, %v1510_v43  ;;  %2450 = vmatpush3.bf16.msra.mxu0 %v2855_v27  ;;  %v1488_v47 = vadd.f32 %v2857_v31, %v1487_v45  ;;  %2423 = vmatpush3.bf16.msra.mxu1 %v2868_v40 }
 0x20b   :  { %2451 = vmatprep.subr.bf16.mxu0 %v2646_v0  ;;  %2424 = vmatprep.subr.bf16.mxu1 %v2646_v0 }
 0x20c   :  { %v1512_v48 = vadd.f32 %v2848_v22, %v1511_v46  ;;  %v2195_v50 = vpop.f32.mrb[12].mxu1  ;;  %v1489_v51 = vadd.f32 %v2857_v31, %v1488_v47 }
 0x20d   :  { %v518_v52 = vpop.f32.mrb[13].mxu1 }
 0x20e   :  { %v1513_v53 = vadd.f32 %v2848_v22, %v1512_v48  ;;  %2453 = vmatpush3.bf16.msra.mxu0 %v2855_v27  ;;  %v1490_v55 = vadd.f32 %v2857_v31, %v1489_v51  ;;  %2426 = vmatpush3.bf16.msra.mxu1 %v2868_v40 }
 0x20f   :  { %2454 = vmatprep.subr.bf16.mxu0 %v2646_v0  ;;  %2427 = vmatprep.subr.bf16.mxu1 %v2646_v0 }
 0x210   :  { %v1514_v56 = vadd.f32 %v2848_v22, %v1513_v53  ;;  %v1491_v58 = vadd.f32 %v2857_v31, %v1490_v55 }
 0x212   :  { %v1515_v60 = vadd.f32 %v2848_v22, %v1514_v56  ;;  %2456 = vmatpush3.bf16.msra.mxu0 %v2855_v27  ;;  %v1492_v61 = vadd.f32 %v2857_v31, %v1491_v58  ;;  %2429 = vmatpush3.bf16.msra.mxu1 %v2868_v40 }
 0x213   :  { %2457 = vmatprep.subr.bf16.mxu0 %v2646_v0  ;;  %2430 = vmatprep.subr.bf16.mxu1 %v2646_v0 }
 0x214   :  { %v1516_v44 = vadd.f32 %v2848_v22, %v1515_v60  ;;  %v2198_v63 = vpop.f32.mrb[14].mxu1  ;;  %v1493_v1 = vadd.f32 %v2857_v31, %v1492_v61 }
 0x215   :  { %v528_v2 = vpop.f32.mrb[15].mxu1 }
 0x216   :  { %2459 = vmatpush3.bf16.msra.mxu0 %v2855_v27  ;;  %v1517_v3 = vadd.f32 %v2848_v22, %v1516_v44  ;;  %v1494_v4 = vadd.f32 %v2857_v31, %v1493_v1  ;;  %2432 = vmatpush3.bf16.msra.mxu1 %v2868_v40 }
 0x217   :  { %2460 = vmatprep.subr.bf16.mxu0 %v2646_v0  ;;  %2433 = vmatprep.subr.bf16.mxu1 %v2646_v0 }
 0x218   :  { %v2229_v5 = vpop.f32.mrb[16].mxu1  ;;  %v1518_v49 = vadd.f32 %v2848_v22, %v1517_v3  ;;  %v1495_v6 = vadd.f32 %v2857_v31, %v1494_v4  ;;  %v2921_v22 = vpop.eup %2518 }
 0x219   :  { %v908_v7 = vpop.f32.mrb[17].mxu1  ;;  %v1460_v28 = vmul.f32 %v2921_v22, %v1456_v13  ;;  %v2926_v33 = vpop.eup %2520 }
 0x21a   :  { %v1201_v8 = vmax.f32 %v908_v7, %v2229_v5  ;;  %2462 = vmatpush3.bf16.msra.mxu0 %v2855_v27  ;;  %v1519_v10 = vrot.slane %v1518_v49, 4  ;;  %2435 = vmatpush3.bf16.msra.mxu1 %v2868_v40  ;;  %v1496_v11 = vadd.f32 %v2857_v31, %v1495_v6  ;;  %v1459_v41 = vmul.f32 %v2926_v33, %v1455_v38  ;;  %v1885_v38 = vld [vmem:[#allocation3] sm:$0x1] }
 0x21b   :  { %2436 = vmatprep.subr.bf16.mxu1 %v2646_v0 }
 0x21c   :  { %v1216_v12 = vrot.slane %v1201_v8, 4  ;;  %v1520_v14 = vadd.f32 %v1519_v10, %v1518_v49  ;;  %v1497_v15 = vadd.f32 %v2857_v31, %v1496_v11  ;;  %v1137_v31 = vld [vmem:[#allocation2 + $0x3] sm:$0x1]  ;;  %v2232_v44 = vpop.f32.mrb[18].mxu1 }
 0x21d   :  { %2354 = vmatmul.mubr.f32.vlgmr.msra.gmra.mrb[34].mxu0 %v1556_v9  ;;  %v918_v62 = vpop.f32.mrb[19].mxu1 }
 0x21e   :  { %v1217_v17 = vmax.f32 %v1201_v8, %v1216_v12  ;;  %v1521_v18 = vrot.slane %v1520_v14, 2  ;;  %2438 = vmatpush3.bf16.msra.mxu1 %v2868_v40  ;;  %v1498_v20 = vrot.slane %v1497_v15, 4 }
 0x21f   :  { %2463 = vmatprep.subr.bf16.mxu1 %v2646_v0 }
 0x220   :  { %v1218_v21 = vrot.slane %v1217_v17, 2  ;;  %v1522_v16 = vadd.f32 %v1521_v18, %v1520_v14  ;;  %v1499_v23 = vadd.f32 %v1498_v20, %v1497_v15  ;;  %v2235_v4 = vpop.f32.mrb[20].mxu1 }
 0x221   :  { %2319 = vmatmul.mubr.f32.vlgmr.msra.gmra.mrb[32].mxu1 %v1555_v19 }
 0x222   :  { %v1219_v24 = vmax.f32 %v1217_v17, %v1218_v21  ;;  %v1523_v25 = vrot.slane %v1522_v16, 1  ;;  %2388 = vmatprep.mubr.msk.f32.mxu1 %vm2647_vm1, %v2645_v59  ;;  %v1500_v26 = vrot.slane %v1499_v23, 2  ;;  %v1557_v17 = vld [vmem:[#allocation10 + $0x18] sm:$0xff] }
 0x224   :  { %v1220_v27 = vrot.slane %v1219_v24, 1  ;;  %v1524_v30 = vadd.f32 %v1523_v25, %v1522_v16  ;;  %v1501_v32 = vadd.f32 %v1500_v26, %v1499_v23 }
 0x226   :  { %v1221_v34 = vmax.f32 %v1219_v24, %v1220_v27  ;;  %v1548_v35 = vadd.f32 %v1524_v30, %v1460_v28  ;;  %v1502_v39 = vrot.slane %v1501_v32, 1  ;;  %v1457_v24 = vld [vmem:[#allocation3 + $0x3] sm:$0x1] }
 0x228   :  { %v1225_v40 = vmax.f32 %v1137_v31, %v1221_v34  ;;  %1552 = vst [vmem:[#allocation3 + $0x2] sm:$0x1] %v1548_v35  ;;  %v1503_v42 = vadd.f32 %v1502_v39, %v1501_v32  ;;  %v1849_v39 = vrot.slane %v2826_v36, %v2804_v29  ;;  %v1853_v36 = vrot.slane %v2926_v33, %v2804_v29 }
 0x22a   :  { %v1257_v59 = vrot.slane %v1225_v40, %v2804_v29  ;;  %1881 = vst [vmem:[#allocation2 + $0x3] sm:$0x1] %v1225_v40  ;;  %v1547_v43 = vadd.f32 %v1503_v42, %v1459_v41  ;;  %v1229_v6 = vsub.f32 %v1137_v31, %v1225_v40  ;;  %v1866_v41 = vmul.f32 0.0, %v1849_v39 }
 0x22c   :  { %v1310_v45 = vsub.f32 %v908_v7, %v1257_v59  ;;  %v1311_v46 = vsub.f32 %v2229_v5, %v1257_v59  ;;  %v1312_v47 = vsub.f32 -inf, %v1257_v59  ;;  %1551 = vst [vmem:[#allocation3 + $0x1] sm:$0x1] %v1547_v43  ;;  %v928_v5 = vpop.f32.mrb[21].mxu1  ;;  %v1236_v11 = vmul.f32 1.442695, %v1229_v6 }
 0x22d   :  { %v2238_v9 = vpop.f32.mrb[22].mxu1 }
 0x22e   :  { %v1422_v48 = vmul.f32 1.442695, %v1310_v45  ;;  %v1424_v50 = vmul.f32 1.442695, %v1311_v46  ;;  %v1426_v51 = vmul.f32 1.442695, %v1312_v47 }
 0x22f   :  { %v938_v10 = vpop.f32.mrb[23].mxu1  ;;  %v1887_v47 = vld [vmem:[#allocation3 + $0x2] sm:$0x1] }
 0x230   :  { %2522 = vpow2.f32 %v1422_v48  ;;  %v2241_v18 = vpop.f32.mrb[24].mxu1 }
 0x231   :  { %2524 = vpow2.f32 %v1424_v50  ;;  %v948_v20 = vpop.f32.mrb[25].mxu1  ;;  %v1857_v50 = vrot.slane %v2921_v22, %v2804_v29 }
 0x232   :  { %2526 = vpow2.f32 %v1426_v51  ;;  %v2244_v25 = vpop.f32.mrb[26].mxu1 }
 0x233   :  { %2528 = vpow2.f32 %v1236_v11  ;;  %v958_v27 = vpop.f32.mrb[27].mxu1  ;;  %v1886_v48 = vld [vmem:[#allocation3 + $0x1] sm:$0x1] }
 0x234   :  { %2530 = vrcp.f32 %v1885_v38 }
 0x235   :  { %2532 = vrcp.f32 %v1887_v47 }
 0x236   :  { %2534 = vrcp.f32 %v1886_v48 }
 0x23a   :  { %v2523_v52 = vpop.eup %2522 }
 0x23b   :  { %v2525_v53 = vpop.eup %2524 }
 0x23c   :  { %v1525_v54 = vadd.f32 %v2525_v53, %v2523_v52  ;;  %v2464_v55 = vpack.c.bf16 %v2525_v53, %v2523_v52  ;;  %v2527_v56 = vpop.eup %2526  ;;  %v1868_v52 = vmul.f32 0.0, %v1857_v50 }
 0x23d   :  { %v2467_v61 = vpack.c.bf16 %v2527_v56, %v2527_v56  ;;  %v2529_v23 = vpop.eup %2528 }
 0x23e   :  { %v1526_v58 = vadd.f32 %v2527_v56, %v1525_v54  ;;  %2465 = vmatpush3.bf16.msra.mxu1 %v2464_v55  ;;  %v1461_v28 = vmul.f32 %v2529_v23, %v1457_v24  ;;  %v2531_v40 = vpop.eup %2530 }
 0x23f   :  { %2466 = vmatprep.subr.bf16.mxu1 %v2646_v0  ;;  %v1904_v43 = vrot.slane %v2531_v40, %v2804_v29  ;;  %v2533_v51 = vpop.eup %2532 }
 0x240   :  { %v1527_v60 = vadd.f32 %v2527_v56, %v1526_v58  ;;  %v1912_v55 = vrot.slane %v2533_v51, %v2804_v29  ;;  %v2535_v58 = vpop.eup %2534 }
 0x241   :  { %v1908_v62 = vrot.slane %v2535_v58, %v2804_v29 }
 0x242   :  { %v1528_v37 = vadd.f32 %v2527_v56, %v1527_v60  ;;  %2468 = vmatpush3.bf16.msra.mxu1 %v2467_v61 }
 0x243   :  { %2469 = vmatprep.subr.bf16.mxu1 %v2646_v0 }
 0x244   :  { %v1529_v63 = vadd.f32 %v2527_v56, %v1528_v37 }
 0x246   :  { %v1530_v1 = vadd.f32 %v2527_v56, %v1529_v63  ;;  %2471 = vmatpush3.bf16.msra.mxu1 %v2467_v61 }
 0x247   :  { %2472 = vmatprep.subr.bf16.mxu1 %v2646_v0 }
 0x248   :  { %v1531_v2 = vadd.f32 %v2527_v56, %v1530_v1 }
 0x24a   :  { %v1532_v3 = vadd.f32 %v2527_v56, %v1531_v2  ;;  %2474 = vmatpush3.bf16.msra.mxu1 %v2467_v61  ;;  %v1861_v2 = vrot.slane %v2529_v23, %v2804_v29 }
 0x24b   :  { %2475 = vmatprep.subr.bf16.mxu1 %v2646_v0 }
 0x24c   :  { %v1533_v49 = vadd.f32 %v2527_v56, %v1532_v3  ;;  %v1869_v3 = vmul.f32 0.0, %v1861_v2 }
 0x24e   :  { %v1534_v57 = vadd.f32 %v2527_v56, %v1533_v49  ;;  %2477 = vmatpush3.bf16.msra.mxu1 %v2467_v61 }
 0x24f   :  { %2478 = vmatprep.subr.bf16.mxu1 %v2646_v0 }
 0x250   :  { %v1535_v7 = vadd.f32 %v2527_v56, %v1534_v57 }
 0x252   :  { %v1536_v8 = vadd.f32 %v2527_v56, %v1535_v7  ;;  %2480 = vmatpush3.bf16.msra.mxu1 %v2467_v61 }
 0x253   :  { %2481 = vmatprep.subr.bf16.mxu1 %v2646_v0 }
 0x254   :  { %v1537_v12 = vadd.f32 %v2527_v56, %v1536_v8 }
 0x256   :  { %2483 = vmatpush3.bf16.msra.mxu1 %v2467_v61  ;;  %v1538_v14 = vadd.f32 %v2527_v56, %v1537_v12 }
 0x257   :  { %2484 = vmatprep.subr.bf16.mxu1 %v2646_v0  ;;  %v2247_v0 = vpop.f32.mrb[28].mxu1 }
 0x258   :  { %v1539_v15 = vadd.f32 %v2527_v56, %v1538_v14  ;;  %v968_v32 = vpop.f32.mrb[29].mxu1 }
 0x259   :  { %v2250_v34 = vpop.f32.mrb[30].mxu1 }
 0x25a   :  { %2486 = vmatpush3.bf16.msra.mxu1 %v2467_v61  ;;  %v1540_v19 = vrot.slane %v1539_v15, 4  ;;  %v978_v35 = vpop.f32.mrb[31].mxu1  ;;  %v1867_v61 = vmul.f32 0.0, %v1853_v36 }
 0x25c   :  { %v1541_v21 = vadd.f32 %v1540_v19, %v1539_v15 }
 0x25d   :  { %2389 = vmatmul.mubr.f32.vlgmr.msra.gmra.mrb[34].mxu1 %v1557_v17 }
 0x25e   :  { %v1542_v16 = vrot.slane %v1541_v21, 2 }
 0x260   :  { %v1543_v13 = vadd.f32 %v1542_v16, %v1541_v21 }
 0x262   :  { %v1544_v26 = vrot.slane %v1543_v13, 1 }
 0x264   :  { %v1545_v30 = vadd.f32 %v1544_v26, %v1543_v13 }
 0x266   :  { %v1549_v31 = vadd.f32 %v1545_v30, %v1461_v28 }
 0x268   :  { %1553 = vst [vmem:[#allocation3 + $0x3] sm:$0x1] %v1549_v31 }
 0x26f   :  { %v1888_v1 = vld [vmem:[#allocation3 + $0x3] sm:$0x1] }
 0x270   :  { %2536 = vrcp.f32 %v1888_v1 }
 0x27a   :  { %v2537_v33 = vpop.eup %2536 }
 0x27b   :  { %v1916_v49 = vrot.slane %v2537_v33, %v2804_v29 }
 0x2b4   :  { %v1624_v42 = vpop.f32.mrb[32].mxu0 }
 0x2b5   :  { %v1870_v59 = vadd.f32 %v1866_v41, %v1624_v42  ;;  %v2285_v45 = vpop.f32.mrb[33].mxu0 }
 0x2b7   :  { %v1921_v46 = vmul.f32 %v1904_v43, %v1870_v59 }
 0x2b9   :  { %1925 = vst [vmem:[#allocation11] sm:$0xff] %v1921_v46 }
 0x2f0   :  { %v1764_v53 = vpop.f32.mrb[34].mxu0 }
 0x2f1   :  { %v1872_v54 = vadd.f32 %v1868_v52, %v1764_v53  ;;  %v2355_v56 = vpop.f32.mrb[35].mxu0 }
 0x2f3   :  { %v1923_v60 = vmul.f32 %v1912_v55, %v1872_v54 }
 0x2f4   :  { %v1694_v37 = vpop.f32.mrb[32].mxu1 }
 0x2f5   :  { %1927 = vst [vmem:[#allocation11 + $0x10] sm:$0xff] %v1923_v60  ;;  %v1871_v44 = vadd.f32 %v1867_v61, %v1694_v37  ;;  %v2320_v63 = vpop.f32.mrb[33].mxu1 }
 0x2f7   :  { %v1922_v22 = vmul.f32 %v1908_v62, %v1871_v44 }
 0x2f9   :  { %1926 = vst [vmem:[#allocation11 + $0x8] sm:$0xff] %v1922_v22 }
 0x330   :  { %v1834_v4 = vpop.f32.mrb[34].mxu1 }
 0x331   :  { %v1873_v5 = vadd.f32 %v1869_v3, %v1834_v4  ;;  %v2390_v57 = vpop.f32.mrb[35].mxu1 }
 0x333   :  { %v1924_v6 = vmul.f32 %v1916_v49, %v1873_v5 }
 0x335   :  { %1928 = vst [vmem:[#allocation11 + $0x18] sm:$0xff] %v1924_v6 }
 0x336   :  { %2621 = shalt.err (!%p2618_p10)
}
 0x337   :  { %s2622_s7 = scalar_lea.hbm %s2966_s3, 512 }
 0x338   :  { %p2623_p11 = scmp.ne.s32.totalorder %s2966_s3, %s2622_s7  ;;  %p2626_p12 = scmp.lt.u32.totalorder %s2622_s7, %s2966_s3 }
 0x33a   :  { %p2628_p13 = pnand %p2626_p12, %p2623_p11 }
 0x33c   :  { %2631 = shalt.err (!%p2628_p13)
}
 0x33d   :  { %1940 = dma.vmem_to_hbm [thread:$0]  %s1935_s18, 512, %s2966_s3, [#allocation7], %s2641_s29, %s2641_s29, %s2642_s30  }
 0x33e   :  { %2636 = dma.done.wait [#allocation7], 512  }
 0x33f   :  { %2637 = vsyncadd [#allocation7], 4294966784 }
 0x340   :  { %1944 = vsyncpa [#allocation6], 1 }
 0x341   :  { %1945 = vsyncpa [#allocation9], 1 }
 0x342   :  { %1946 = vsyncpa [#allocation7], 1 }

</bundles_post_ra>
